<compile_context>
chip_gen: v5e
topology: v5e:2x2
jax: 0.10.0
libtpu: 0.0.40
codegen_flags: <defaults>
</compile_context>

<pallas_src>
import functools

import jax
import jax.numpy as jnp
from jax.experimental import pallas as pl
from jax.experimental.pallas import tpu as pltpu

LN_EPS = 1e-12


def _layernorm_epilogue(y, g, beta):
    """LayerNorm over the last dim of f32 `y`, gamma/beta are (1, N) f32.

    Written as y*scale + (beta - mean*scale) so the centered tensor is never
    kept live as a full (tm, N) tile (only (tm, 1) row stats).
    """
    mean = jnp.mean(y, axis=-1, keepdims=True)
    var = jnp.mean(jnp.square(y - mean), axis=-1, keepdims=True)
    scale = jax.lax.rsqrt(var + LN_EPS) * g          # (tm, N), gamma folded in
    shift = beta - mean * scale                      # (tm, N)
    return y * scale + shift


def bert_output_kernel(h_ref, x_ref, w_ref, b_ref, g_ref, beta_ref, o_ref, *,
                       compute_dtype):
    # dense: [tm, K] @ [K, N] -> [tm, N]; activation cast to bf16 in-kernel
    # (MXU-native operands, f32 accumulation).
    h = h_ref[...].astype(compute_dtype)
    y = jnp.dot(h, w_ref[...], preferred_element_type=jnp.float32)
    # dropout: inference mode -> identity
    # TODO(synk): training-mode dropout (pltpu.prng_random_bits mask) not emitted.
    y = y + b_ref[...] + x_ref[...].astype(jnp.float32)   # bias + residual (f32)
    o_ref[...] = _layernorm_epilogue(y, g_ref[...], beta_ref[...]).astype(o_ref.dtype)


def bert_output_kernel_ksplit(h_ref, x_ref, w_ref, b_ref, g_ref, beta_ref,
                              o_ref, acc_ref, *, compute_dtype):
    """K-tiled variant for weights too large to stay resident in VMEM."""
    k = pl.program_id(1)

    @pl.when(k == 0)
    def _():
        acc_ref[...] = jnp.zeros_like(acc_ref)

    h = h_ref[...].astype(compute_dtype)
    acc_ref[...] += jnp.dot(h, w_ref[...], preferred_element_type=jnp.float32)

    @pl.when(k == pl.num_programs(1) - 1)
    def _():
        # dropout: inference mode -> identity
        y = acc_ref[...] + b_ref[...] + x_ref[...].astype(jnp.float32)
        o_ref[...] = _layernorm_epilogue(y, g_ref[...], beta_ref[...]).astype(o_ref.dtype)


def _vmem_capacity_bytes():
    try:
        return int(pltpu.get_tpu_info().vmem_capacity_bytes)
    except Exception:
        # Conservative fallback (v7x per-core size) if the query is unavailable.
        return 64 * 1024 * 1024


def _pick_row_tile(M, target):
    """Largest tile <= target that is a multiple of 8 and divides M, else M."""
    if M <= target or M % 8 != 0:
        return M
    tm = (min(target, M) // 8) * 8
    while tm >= 8:
        if M % tm == 0:
            return tm
        tm -= 8
    return M


def _pick_k_tile(K, target):
    """Largest tile <= target that is a multiple of 128 and divides K, else K."""
    if K % 128 != 0:
        return K
    tk = max(128, (min(target, K) // 128) * 128)
    while tk >= 128:
        if K % tk == 0:
            return tk
        tk -= 128
    return K


def bert_output(hidden_states, input_tensor, weight, bias, gamma, beta, *,
                tm=None, tk=None, compute_dtype=jnp.bfloat16,
                force_k_split=False):
    """hidden_states: [M, K]; input_tensor: [M, N]; weight: [K, N] -> [M, N]."""
    M, K = hidden_states.shape
    M2, N = input_tensor.shape
    assert M == M2, "row count mismatch between hidden_states and input_tensor"
    out_dtype = hidden_states.dtype

    vmem_cap = _vmem_capacity_bytes()
    vmem_clamp = (vmem_cap * 3) // 4          # leave headroom for Mosaic scratch

    tm_target = tm if tm is not None else (512 if vmem_cap >= 96 * 1024 * 1024 else 256)
    tm = _pick_row_tile(M, tm_target)
    grid_m = M // tm

    cbytes = jnp.dtype(compute_dtype).itemsize
    hbytes = jnp.dtype(hidden_states.dtype).itemsize
    xbytes = jnp.dtype(input_tensor.dtype).itemsize
    obytes = jnp.dtype(out_dtype).itemsize

    # Weight cast stays in the wrapper (one-time K*N pass, halves its DMA);
    # activations are cast in-kernel.
    w = weight.astype(compute_dtype)
    b2 = bias.reshape(1, N).astype(jnp.float32)
    g2 = gamma.reshape(1, N).astype(jnp.float32)
    be2 = beta.reshape(1, N).astype(jnp.float32)

    cost = pl.CostEstimate(
        flops=2 * M * K * N,
        transcendentals=M,                     # one rsqrt per row
        bytes_accessed=(M * K * hbytes + K * N * cbytes
                        + M * N * xbytes + M * N * obytes + 3 * N * 4),
    )

    # Fallback: if the compute-dtype weight can't comfortably stay resident,
    # tile K and accumulate in an f32 VMEM scratch.
    weight_bytes = K * N * cbytes
    k_split = force_k_split or weight_bytes > 16 * 1024 * 1024
    if k_split:
        tk_chosen = _pick_k_tile(K, tk if tk is not None else 512)
        if tk_chosen == K and not force_k_split:
            k_split = False            # can't split cleanly; keep weight resident

    if not k_split:
        vmem_bytes = (
            K * N * cbytes              # resident weight (single-buffered)
            + tm * K * hbytes * 2       # hidden tile (double-buffered)
            + tm * K * cbytes           # in-kernel bf16 copy of the hidden tile
            + tm * N * xbytes * 2       # residual tile
            + tm * N * obytes * 2       # output tile
            + 3 * N * 4                 # bias / gamma / beta
            + tm * N * 4 * 3            # f32 epilogue intermediates / headroom
        )
        vmem_bytes = min(int(vmem_bytes * 1.25) + (1 << 20), vmem_clamp)

        grid_spec = pltpu.PrefetchScalarGridSpec(
            num_scalar_prefetch=0,
            grid=(grid_m,),
            in_specs=[
                pl.BlockSpec((tm, K), lambda i: (i, 0)),   # hidden_states tile
                pl.BlockSpec((tm, N), lambda i: (i, 0)),   # residual tile
                # Grid-invariant operands: single-buffered (no wasted 2nd copy).
                pl.BlockSpec((K, N), lambda i: (0, 0), pipeline_mode=pl.Buffered(1)),
                pl.BlockSpec((1, N), lambda i: (0, 0), pipeline_mode=pl.Buffered(1)),
                pl.BlockSpec((1, N), lambda i: (0, 0), pipeline_mode=pl.Buffered(1)),
                pl.BlockSpec((1, N), lambda i: (0, 0), pipeline_mode=pl.Buffered(1)),
            ],
            out_specs=pl.BlockSpec((tm, N), lambda i: (i, 0)),
        )
        kernel = functools.partial(bert_output_kernel, compute_dtype=compute_dtype)
        dim_sem = ("parallel",)
    else:
        tk = tk_chosen
        grid_k = K // tk
        vmem_bytes = (
            tk * N * cbytes * 2         # weight tiles (double-buffered)
            + tm * tk * hbytes * 2      # hidden tiles
            + tm * tk * cbytes          # in-kernel bf16 copy
            + tm * N * xbytes * 2       # residual tile
            + tm * N * obytes * 2       # output tile
            + tm * N * 4                # f32 accumulator scratch
            + 3 * N * 4                 # bias / gamma / beta
            + tm * N * 4 * 3            # f32 epilogue intermediates / headroom
        )
        vmem_bytes = min(int(vmem_bytes * 1.25) + (1 << 20), vmem_clamp)

        grid_spec = pltpu.PrefetchScalarGridSpec(
            num_scalar_prefetch=0,
            grid=(grid_m, grid_k),
            in_specs=[
                pl.BlockSpec((tm, tk), lambda i, k: (i, k)),   # hidden tile
                pl.BlockSpec((tm, N), lambda i, k: (i, 0)),    # residual tile
                pl.BlockSpec((tk, N), lambda i, k: (k, 0)),    # weight tile
                pl.BlockSpec((1, N), lambda i, k: (0, 0), pipeline_mode=pl.Buffered(1)),
                pl.BlockSpec((1, N), lambda i, k: (0, 0), pipeline_mode=pl.Buffered(1)),
                pl.BlockSpec((1, N), lambda i, k: (0, 0), pipeline_mode=pl.Buffered(1)),
            ],
            out_specs=pl.BlockSpec((tm, N), lambda i, k: (i, 0)),
            scratch_shapes=[pltpu.VMEM((tm, N), jnp.float32)],
        )
        kernel = functools.partial(bert_output_kernel_ksplit, compute_dtype=compute_dtype)
        dim_sem = ("parallel", "arbitrary")

    return pl.pallas_call(
        kernel,
        out_shape=jax.ShapeDtypeStruct((M, N), out_dtype),
        grid_spec=grid_spec,
        compiler_params=pltpu.CompilerParams(
            dimension_semantics=dim_sem,
            vmem_limit_bytes=int(vmem_bytes),
        ),
        cost_estimate=cost,
    )(hidden_states, input_tensor, w, b2, g2, be2)


def bert_output_ref(hidden_states, input_tensor, weight, bias, gamma, beta,
                    compute_dtype=jnp.bfloat16):
    # Reference with the same bf16 operand quantization as the kernel.
    # (Strict f32 parity with torch is intentionally NOT provided.)
    h = hidden_states.astype(compute_dtype).astype(jnp.float32)
    w = weight.astype(compute_dtype).astype(jnp.float32)
    y = h @ w + bias
    y = y + input_tensor
    mean = jnp.mean(y, axis=-1, keepdims=True)
    var = jnp.mean((y - mean) ** 2, axis=-1, keepdims=True)
    return (y - mean) / jnp.sqrt(var + LN_EPS) * gamma + beta


if __name__ == "__main__":
    key = jax.random.PRNGKey(0)

    def make_case(case_key, B, S, H, I):
        k1, k2, k3, k4 = jax.random.split(case_key, 4)
        hidden_states = jax.random.normal(k1, (B, S, I), dtype=jnp.float32)
        input_tensor = jax.random.normal(k2, (B, S, H), dtype=jnp.float32)
        bound = 1.0 / (I ** 0.5)
        weight = jax.random.uniform(k3, (I, H), minval=-bound, maxval=bound,
                                    dtype=jnp.float32)
        bias = jax.random.uniform(k4, (H,), minval=-bound, maxval=bound,
                                  dtype=jnp.float32)
        gamma = jnp.ones((H,), dtype=jnp.float32)
        beta = jnp.zeros((H,), dtype=jnp.float32)
        return hidden_states, input_tensor, weight, bias, gamma, beta

    key_a, key_b = jax.random.split(key)

    # Case 1: tiny config implied by the module (batch=2, seq=8, hidden=32,
    # intermediate=128) -> resident-weight path, no padding (tm = M = 16).
    B, S, H, I = 2, 8, 32, 128
    hs, xt, w, b, g, be = make_case(key_a, B, S, H, I)
    h2 = hs.reshape(B * S, I)
    x2 = xt.reshape(B * S, H)
    out = jax.block_until_ready(bert_output(h2, x2, w, b, g, be))
    ref = bert_output_ref(h2, x2, w, b, g, be)
    assert jnp.allclose(out, ref, atol=1e-2, rtol=1e-2), "mismatch (resident path)"

    # Case 2: lane-dense shapes (N, K multiples of 128), forcing the K-split
    # accumulator fallback path so it is validated too.
    B, S, H, I = 2, 64, 128, 512
    hs, xt, w, b, g, be = make_case(key_b, B, S, H, I)
    h2 = hs.reshape(B * S, I)
    x2 = xt.reshape(B * S, H)
    out = jax.block_until_ready(
        bert_output(h2, x2, w, b, g, be, force_k_split=True, tk=128))
    ref = bert_output_ref(h2, x2, w, b, g, be)
    assert jnp.allclose(out, ref, atol=1e-2, rtol=1e-2), "mismatch (K-split path)"

    print("KERNEL_OK")
</pallas_src>

<mosaic_0001>
module attributes {stable_mosaic.version = 11 : i64} {
  func.func @bert_output_kernel(%arg0: i32, %arg1: memref<16x128xf32, #tpu.memory_space<vmem>>, %arg2: memref<16x32xf32, #tpu.memory_space<vmem>>, %arg3: memref<128x32xbf16, #tpu.memory_space<vmem>>, %arg4: memref<1x32xf32, #tpu.memory_space<vmem>>, %arg5: memref<1x32xf32, #tpu.memory_space<vmem>>, %arg6: memref<1x32xf32, #tpu.memory_space<vmem>>, %arg7: memref<16x32xf32, #tpu.memory_space<vmem>>) attributes {dimension_semantics = [#tpu.dimension_semantics<parallel>], iteration_bounds = array<i64: 1>, scalar_prefetch = 0 : i64, scratch_operands = 0 : i64, tpu.core_type = #tpu.core_type<tc>, window_params = [{transform_indices = @transform_0, window_bounds = array<i64: 16, 128>}, {transform_indices = @transform_1, window_bounds = array<i64: 16, 32>}, {pipeline_mode = #tpu.pipeline_mode<synchronous>, transform_indices = @transform_2, window_bounds = array<i64: 128, 32>}, {pipeline_mode = #tpu.pipeline_mode<synchronous>, transform_indices = @transform_3, window_bounds = array<i64: 1, 32>}, {pipeline_mode = #tpu.pipeline_mode<synchronous>, transform_indices = @transform_4, window_bounds = array<i64: 1, 32>}, {pipeline_mode = #tpu.pipeline_mode<synchronous>, transform_indices = @transform_5, window_bounds = array<i64: 1, 32>}, {transform_indices = @transform_6, window_bounds = array<i64: 16, 32>}]} {
    %c0 = arith.constant 0 : index
    %c0_0 = arith.constant 0 : index
    %0 = vector.load %arg1[%c0, %c0_0] : memref<16x128xf32, #tpu.memory_space<vmem>>, vector<16x128xf32>
    %1 = arith.truncf %0 : vector<16x128xf32> to vector<16x128xbf16>
    %c0_1 = arith.constant 0 : index
    %c0_2 = arith.constant 0 : index
    %2 = vector.load %arg3[%c0_1, %c0_2] : memref<128x32xbf16, #tpu.memory_space<vmem>>, vector<128x32xbf16>
    %cst = arith.constant dense<0.000000e+00> : vector<16x32xf32>
    %3 = tpu.matmul %1, %2, %cst {dimension_numbers = #tpu.dot_dimension_numbers<[1], [0], [0], [1], [0, 0, 1, 1], [], []>} : vector<16x128xbf16>, vector<128x32xbf16>, vector<16x32xf32> -> vector<16x32xf32>
    %c0_3 = arith.constant 0 : index
    %c0_4 = arith.constant 0 : index
    %4 = vector.load %arg4[%c0_3, %c0_4] : memref<1x32xf32, #tpu.memory_space<vmem>>, vector<1x32xf32>
    %5 = vector.broadcast %4 : vector<1x32xf32> to vector<16x32xf32>
    %6 = arith.addf %3, %5 : vector<16x32xf32>
    %c0_5 = arith.constant 0 : index
    %c0_6 = arith.constant 0 : index
    %7 = vector.load %arg2[%c0_5, %c0_6] : memref<16x32xf32, #tpu.memory_space<vmem>>, vector<16x32xf32>
    %8 = arith.addf %6, %7 : vector<16x32xf32>
    %c0_7 = arith.constant 0 : index
    %c0_8 = arith.constant 0 : index
    %9 = vector.load %arg5[%c0_7, %c0_8] : memref<1x32xf32, #tpu.memory_space<vmem>>, vector<1x32xf32>
    %c0_9 = arith.constant 0 : index
    %c0_10 = arith.constant 0 : index
    %10 = vector.load %arg6[%c0_9, %c0_10] : memref<1x32xf32, #tpu.memory_space<vmem>>, vector<1x32xf32>
    %cst_11 = arith.constant dense<0.000000e+00> : vector<16xf32>
    %11 = vector.multi_reduction <add>, %8, %cst_11 [1] : vector<16x32xf32> to vector<16xf32>
    %12 = vector.shape_cast %11 : vector<16xf32> to vector<16x1xf32>
    %cst_12 = arith.constant 3.200000e+01 : f32
    %13 = vector.broadcast %cst_12 : f32 to vector<16x1xf32>
    %14 = arith.divf %12, %13 : vector<16x1xf32>
    %15 = vector.broadcast %14 : vector<16x1xf32> to vector<16x32xf32>
    %16 = arith.subf %8, %15 : vector<16x32xf32>
    %17 = arith.mulf %16, %16 : vector<16x32xf32>
    %cst_13 = arith.constant dense<0.000000e+00> : vector<16xf32>
    %18 = vector.multi_reduction <add>, %17, %cst_13 [1] : vector<16x32xf32> to vector<16xf32>
    %19 = vector.shape_cast %18 : vector<16xf32> to vector<16x1xf32>
    %cst_14 = arith.constant 3.200000e+01 : f32
    %20 = vector.broadcast %cst_14 : f32 to vector<16x1xf32>
    %21 = arith.divf %19, %20 : vector<16x1xf32>
    %cst_15 = arith.constant 9.99999996E-13 : f32
    %22 = vector.broadcast %cst_15 : f32 to vector<16x1xf32>
    %23 = arith.addf %21, %22 : vector<16x1xf32>
    %24 = math.rsqrt %23 : vector<16x1xf32>
    %25 = vector.broadcast %24 : vector<16x1xf32> to vector<16x32xf32>
    %26 = vector.broadcast %9 : vector<1x32xf32> to vector<16x32xf32>
    %27 = arith.mulf %25, %26 : vector<16x32xf32>
    %28 = vector.broadcast %14 : vector<16x1xf32> to vector<16x32xf32>
    %29 = arith.mulf %28, %27 : vector<16x32xf32>
    %30 = vector.broadcast %10 : vector<1x32xf32> to vector<16x32xf32>
    %31 = arith.subf %30, %29 : vector<16x32xf32>
    %32 = arith.mulf %8, %27 : vector<16x32xf32>
    %33 = arith.addf %32, %31 : vector<16x32xf32>
    %c0_16 = arith.constant 0 : index
    %c0_17 = arith.constant 0 : index
    %34 = vector.load %arg7[%c0_16, %c0_17] : memref<16x32xf32, #tpu.memory_space<vmem>>, vector<16x32xf32>
    tpu.vector_store %arg7[%c0_16, %c0_17], %33 {strides = array<i32>} : memref<16x32xf32, #tpu.memory_space<vmem>>, vector<16x32xf32>,
    return
  }
  func.func @transform_0(%arg0: i32) -> (i32, i32) {
    %c0_i32 = arith.constant 0 : i32
    %c0_i32_0 = arith.constant 0 : i32
    return %arg0, %c0_i32 : i32, i32
  }
  func.func @transform_1(%arg0: i32) -> (i32, i32) {
    %c0_i32 = arith.constant 0 : i32
    %c0_i32_0 = arith.constant 0 : i32
    return %arg0, %c0_i32 : i32, i32
  }
  func.func @transform_2(%arg0: i32) -> (i32, i32) {
    %c0_i32 = arith.constant 0 : i32
    %c0_i32_0 = arith.constant 0 : i32
    %c0_i32_1 = arith.constant 0 : i32
    return %c0_i32, %c0_i32_0 : i32, i32
  }
  func.func @transform_3(%arg0: i32) -> (i32, i32) {
    %c0_i32 = arith.constant 0 : i32
    %c0_i32_0 = arith.constant 0 : i32
    %c0_i32_1 = arith.constant 0 : i32
    return %c0_i32, %c0_i32_0 : i32, i32
  }
  func.func @transform_4(%arg0: i32) -> (i32, i32) {
    %c0_i32 = arith.constant 0 : i32
    %c0_i32_0 = arith.constant 0 : i32
    %c0_i32_1 = arith.constant 0 : i32
    return %c0_i32, %c0_i32_0 : i32, i32
  }
  func.func @transform_5(%arg0: i32) -> (i32, i32) {
    %c0_i32 = arith.constant 0 : i32
    %c0_i32_0 = arith.constant 0 : i32
    %c0_i32_1 = arith.constant 0 : i32
    return %c0_i32, %c0_i32_0 : i32, i32
  }
  func.func @transform_6(%arg0: i32) -> (i32, i32) {
    %c0_i32 = arith.constant 0 : i32
    %c0_i32_0 = arith.constant 0 : i32
    return %arg0, %c0_i32 : i32, i32
  }
}

</mosaic_0001>

<bundles_post_ra>
// kernel: tpu_custom_call.1
= control target key start
LH: loop header
LB: loop body
LE: loop exit
PB: predicated region body
PF: predicated region fallthrough
CT: control target
= control target key end

     0   :  { %s378_s0 = inlined_call_operand.vmem [shape: f32[16,128], index: 0, kind: input, shape index: {}]   ;;  %s379_s1 = inlined_call_operand.vmem [shape: f32[16,32], index: 1, kind: input, shape index: {}]   ;;  %s380_s2 = inlined_call_operand.vmem [shape: bf16[128,32], index: 2, kind: input, shape index: {}]   ;;  %s381_s3 = inlined_call_operand.vmem [shape: f32[1,32], index: 3, kind: input, shape index: {}]   ;;  %s382_s4 = inlined_call_operand.vmem [shape: f32[1,32], index: 4, kind: input, shape index: {}]   ;;  %s383_s5 = inlined_call_operand.vmem [shape: f32[1,32], index: 5, kind: input, shape index: {}]   ;;  %s384_s6 = inlined_call_operand.hbm [shape: f32[16,32], index: 6, kind: output, shape index: {}]  }
   0x1   :  { %v240_v0 = vld [vmem:[%s380_s2 + $0x38] sm:$0xff]  ;;  %v239_v1 = vld [vmem:[%s380_s2 + $0x30] sm:$0xff] }
   0x2   :  { %95 = vmatpush.bf16.msra.mxu0 %v240_v0 }
   0x3   :  { %11 = vsyncpa [#allocation3], 0  ;;  %v238_v2 = vld [vmem:[%s380_s2 + $0x28] sm:$0xff]  ;;  %v237_v3 = vld [vmem:[%s380_s2 + $0x20] sm:$0xff]  ;;  %vm115_vm0 = vcmask 261120   ;;  %v280_v22 = vmov 32.0  }
   0x4   :  { %v236_v4 = vld [vmem:[%s380_s2 + $0x18] sm:$0xff]  ;;  %v235_v5 = vld [vmem:[%s380_s2 + $0x10] sm:$0xff]  ;;  %v234_v6 = vld [vmem:[%s380_s2 + $0x8] sm:$0xff]  ;;  %248 = vrcp.f32 %v280_v22  ;;  %s189_s25 = sshll.u32 %s384_s6, 4  ;;  %s282_s26 = smov 128   ;;  %s190_s25 = int_to_ptr.hbm [resolvable:$true] %s189_s25 }
   0x5   :  { %v233_v7 = vld [vmem:[%s380_s2] sm:$0xff]  ;;  %v25_v9 = vld [vmem:[%s378_s0 + $0x8] sm:$0xff]  ;;  %s283_s27 = smov 8  }
   0x6   :  { %96 = vmatpush.bf16.msra.mxu0 %v239_v1  ;;  %v24_v8 = vld [vmem:[%s378_s0] sm:$0xff]  ;;  %v110_v18 = vld [vmem:[%s379_s1 + $0x8] sm:$0xff] }
   0x7   :  { %v26_v10 = vpack.c.bf16 %v25_v9, %v24_v8  ;;  %v245_v11 = vld [vmem:[%s381_s3] ss:$0 sm:$0xff] }
   0x8   :  { %v109_v13 = vld [vmem:[%s379_s1] sm:$0xff] }
   0x9   :  { %v246_v51 = vld [vmem:[%s382_s4] ss:$0 sm:$0xff]  ;;  %s281_s4 = smov [#allocation2]  }
   0xa   :  { %97 = vmatpush.bf16.msra.mxu0 %v238_v2  ;;  %v249_v23 = vpop.eup %248  ;;  %v247_v56 = vld [vmem:[%s383_s5] ss:$0 sm:$0xff]  ;;  %s187_s23 = sshll.u32 %s281_s4, 4  ;;  %s188_s23 = int_to_ptr.vmem [resolvable:$true] %s187_s23 }
   0xb   :  { %v123_v24 = vmul.f32 32.0, %v249_v23  ;;  %vm127_vm1 = vweird.f32 %v249_v23 }
   0xd   :  { %v124_v25 = vsub.f32 1.0, %v123_v24 }
   0xe   :  { %98 = vmatpush.bf16.msra.mxu0 %v237_v3 }
   0xf   :  { %v125_v26 = vmul.f32 %v249_v23, %v124_v25 }
  0x11   :  { %v126_v27 = vadd.f32 %v249_v23, %v125_v26 }
  0x12   :  { %99 = vmatpush.bf16.msra.mxu0 %v236_v4 }
  0x13   :  { %v128_v28 = vsel %vm127_vm1, %v249_v23, %v126_v27 }
  0x16   :  { %100 = vmatpush.bf16.msra.mxu0 %v235_v5 }
  0x1a   :  { %101 = vmatpush.bf16.msra.mxu0 %v234_v6 }
  0x1e   :  { %102 = vmatpush.bf16.msra.mxu0 %v233_v7 }
  0x21   :  { %103 = vmatmul.bf16.vlgmr.msra.gmra.mxu0 %v26_v10 }
  0x9e   :  { %v104_v12 = vpop.f32.mrf.mxu0 }
  0x9f   :  { %v105_v14 = vadd.f32 %v245_v11, %v104_v12 }
  0xa1   :  { %v111_v15 = vadd.f32 %v109_v13, %v105_v14 }
  0xa3   :  { %v116_v16 = vsel %vm115_vm0, %v111_v15, 0.0 }
  0xa4   :  { %117 = vadd.xlane.f32.xlu0 %v116_v16 }
  0xa6   :  { %v106_v17 = vpop.f32.mrf.mxu0 }
  0xa7   :  { %v107_v19 = vadd.f32 %v245_v11, %v106_v17 }
  0xa9   :  { %v359_v20 = vadd.f32 %v110_v18, %v107_v19 }
  0xab   :  { %v119_v21 = vsel %vm115_vm0, %v359_v20, 0.0 }
  0xac   :  { %120 = vadd.xlane.f32.xlu0 %v119_v21 }
 0x117   :  { %v118_v29 = vpop.xlane.xlu0 %117 }
 0x118   :  { %v129_v30 = vmul.f32 %v128_v28, %v118_v29 }
 0x11a   :  { %v131_v31 = vsub.f32 %v111_v15, %v129_v30 }
 0x11c   :  { %v133_v32 = vmul.f32 %v131_v31, %v131_v31 }
 0x11e   :  { %v135_v33 = vsel %vm115_vm0, %v133_v32, 0.0 }
 0x11f   :  { %136 = vadd.xlane.f32.xlu1 %v135_v33  ;;  %v121_v34 = vpop.xlane.xlu0 %120 }
 0x120   :  { %v130_v35 = vmul.f32 %v128_v28, %v121_v34 }
 0x122   :  { %v132_v36 = vsub.f32 %v359_v20, %v130_v35 }
 0x124   :  { %v134_v37 = vmul.f32 %v132_v36, %v132_v36 }
 0x126   :  { %v138_v38 = vsel %vm115_vm0, %v134_v37, 0.0 }
 0x127   :  { %139 = vadd.xlane.f32.xlu1 %v138_v38 }
 0x192   :  { %v137_v39 = vpop.xlane.xlu1 %136 }
 0x193   :  { %v141_v40 = vmul.f32 %v137_v39, %v128_v28 }
 0x195   :  { %v143_v41 = vadd.f32 1e-12, %v141_v40 }
 0x197   :  { %250 = vrsqrt.f32 %v143_v41  ;;  %vm151_vm3 = vweird.f32 %v143_v41 }
 0x19a   :  { %v140_v42 = vpop.xlane.xlu1 %139 }
 0x19b   :  { %v142_v43 = vmul.f32 %v140_v42, %v128_v28 }
 0x19d   :  { %v251_v44 = vpop.eup %250  ;;  %v144_v45 = vadd.f32 1e-12, %v142_v43 }
 0x19e   :  { %v146_v46 = vmul.f32 %v251_v44, %v143_v41  ;;  %vm152_vm2 = vweird.f32 %v251_v44 }
 0x19f   :  { %252 = vrsqrt.f32 %v144_v45  ;;  %vm153_vm4 = vmor %vm151_vm3, %vm152_vm2  ;;  %vm161_vm6 = vweird.f32 %v144_v45 }
 0x1a0   :  { %v147_v47 = vmul.f32 %v251_v44, %v146_v46 }
 0x1a2   :  { %v148_v48 = vmul.f32 0.5, %v147_v47 }
 0x1a4   :  { %v149_v49 = vsub.f32 1.5, %v148_v48 }
 0x1a5   :  { %v253_v50 = vpop.eup %252 }
 0x1a6   :  { %v150_v52 = vmul.f32 %v251_v44, %v149_v49  ;;  %v156_v53 = vmul.f32 %v253_v50, %v144_v45  ;;  %vm162_vm5 = vweird.f32 %v253_v50 }
 0x1a7   :  { %vm163_vm7 = vmor %vm161_vm6, %vm162_vm5 }
 0x1a8   :  { %v154_v54 = vsel %vm153_vm4, %v251_v44, %v150_v52  ;;  %v157_v55 = vmul.f32 %v253_v50, %v156_v53 }
 0x1a9   :  { %v168_v57 = vmul.f32 %v246_v51, %v154_v54 }
 0x1aa   :  { %v158_v58 = vmul.f32 0.5, %v157_v55 }
 0x1ab   :  { %v170_v59 = vmul.f32 %v168_v57, %v129_v30  ;;  %v177_v62 = vmul.f32 %v168_v57, %v111_v15 }
 0x1ac   :  { %v159_v60 = vsub.f32 1.5, %v158_v58 }
 0x1ad   :  { %v175_v61 = vsub.f32 %v247_v56, %v170_v59 }
 0x1ae   :  { %v160_v63 = vmul.f32 %v253_v50, %v159_v60 }
 0x1af   :  { %v179_v0 = vadd.f32 %v177_v62, %v175_v61 }
 0x1b0   :  { %v164_v1 = vsel %vm163_vm7, %v253_v50, %v160_v63 }
 0x1b1   :  { %v169_v2 = vmul.f32 %v246_v51, %v164_v1  ;;  %181 = vst.msk [vmem:[#allocation2] sm:$0xff] %vm115_vm0, %v179_v0 }
 0x1b3   :  { %v171_v3 = vmul.f32 %v169_v2, %v130_v35  ;;  %v178_v5 = vmul.f32 %v169_v2, %v359_v20 }
 0x1b5   :  { %v176_v4 = vsub.f32 %v247_v56, %v171_v3 }
 0x1b7   :  { %v180_v6 = vadd.f32 %v178_v5, %v176_v4 }
 0x1b9   :  { %182 = vst.msk [vmem:[#allocation2 + $0x8] sm:$0xff] %vm115_vm0, %v180_v6 }
 0x1ba   :  { %195 = dma.vmem_to_hbm [thread:$0]  %s188_s23, 256, %s190_s25, [#allocation3], %s282_s26, %s282_s26, %s283_s27  }
 0x1bb   :  { %278 = dma.done.wait [#allocation3], 256  }
 0x1bc   :  { %279 = vsyncadd [#allocation3], 4294967040 }
 0x1bd   :  { %200 = vsyncpa [#allocation3], 1 }

</bundles_post_ra>
